<compile_context>
chip_gen: v6e
topology: v6e:2x2x1
jax: 0.10.0
libtpu: 0.0.40
codegen_flags: <defaults>
</compile_context>

<pallas_src>
import functools
import math

import jax
import jax.numpy as jnp
from jax import lax
from jax.experimental import pallas as pl
from jax.experimental.pallas import tpu as pltpu


# ----------------------------- fused kernel --------------------------------

def _mha_fused_kernel(q_ref, k_ref, v_ref,
                      wq_ref, wk_ref, wv_ref, wo_ref,
                      bq_ref, bk_ref, bv_ref, bo_ref,
                      o_ref, *w_out_ref,
                      num_heads, tgt_len, src_len, batch,
                      need_weights, matmul_dtype):
    """Whole forward in one invocation (no grid).

    q_ref: (L*N, E)   k_ref/v_ref: (S*N, E)   rows ordered (seq, batch)
    wq/wk/wv/wo: (E, E) in PyTorch (out_features, in_features) layout
                 (wq/bq already pre-scaled by 1/sqrt(D))
    bq/bk/bv/bo: (1, E)
    o_ref: (L*N, E)
    w_out_ref (optional): (N, L, S) head-averaged attention weights
    """
    H, L, S, N = num_heads, tgt_len, src_len, batch
    E = q_ref.shape[-1]
    D = E // H
    cd = matmul_dtype

    # x @ W.T with W stored (out_features, in_features): contract dim 1 w/ dim 1.
    dn = (((1,), (1,)), ((), ()))

    # --- fused input projections on batch-folded rows (weights VMEM-resident) ---
    q = lax.dot_general(q_ref[...].astype(cd), wq_ref[...].astype(cd), dn,
                        preferred_element_type=jnp.float32) + bq_ref[...]
    k = lax.dot_general(k_ref[...].astype(cd), wk_ref[...].astype(cd), dn,
                        preferred_element_type=jnp.float32) + bk_ref[...]
    v = lax.dot_general(v_ref[...].astype(cd), wv_ref[...].astype(cd), dn,
                        preferred_element_type=jnp.float32) + bv_ref[...]

    # --- one batched attention over all (batch, head) pairs ---
    # rows are ordered (l, n); split heads and move (n, h) to the batch dim,
    # b = n*H + h (matches PyTorch's reshape(L, N*H, D) ordering).
    q3 = q.reshape(L, N, H, D).transpose(1, 2, 0, 3).reshape(N * H, L, D)
    k3 = k.reshape(S, N, H, D).transpose(1, 2, 0, 3).reshape(N * H, S, D)
    v3 = v.reshape(S, N, H, D).transpose(1, 2, 0, 3).reshape(N * H, S, D)

    s = jnp.einsum("bld,bsd->bls", q3.astype(cd), k3.astype(cd),
                   preferred_element_type=jnp.float32)          # (N*H, L, S)

    # Numerically-stable softmax, all in f32, exact normalisation (no approx
    # reciprocal -> returned weights sum to 1 per row).
    m = jnp.max(s, axis=-1, keepdims=True)
    p = jnp.exp(s - m)
    w = p / jnp.sum(p, axis=-1, keepdims=True)                  # (N*H, L, S)

    o3 = jnp.einsum("bls,bsd->bld", w.astype(cd), v3.astype(cd),
                    preferred_element_type=jnp.float32)         # (N*H, L, D)

    # Back to (L*N, E) row layout for the output projection / store.
    o2 = o3.reshape(N, H, L, D).transpose(2, 0, 1, 3).reshape(L * N, E)
    out = lax.dot_general(o2.astype(cd), wo_ref[...].astype(cd), dn,
                          preferred_element_type=jnp.float32) + bo_ref[...]
    o_ref[...] = out.astype(o_ref.dtype)

    if need_weights:
        w_ref = w_out_ref[0]
        # Head average, matching average_attn_weights=True.
        w_ref[...] = jnp.mean(w.reshape(N, H, L, S), axis=1).astype(w_ref.dtype)


# --------------------------- module forward glue ---------------------------

def multihead_attention_forward(query, key, value, params, num_heads,
                                need_weights=True,
                                matmul_dtype=jnp.float32):
    """Matches nn.MultiheadAttention(embed_dim, num_heads)(q, k, v).

    query: (L, N, E), key/value: (S, N, E) (seq-first, PyTorch default).
    Returns (attn_output (L, N, E), attn_output_weights (N, L, S) or None).
    """
    L, N, E = query.shape
    S = key.shape[0]
    H = num_heads
    assert E % H == 0
    D = E // H
    scale = 1.0 / math.sqrt(D)

    # PyTorch packs q/k/v projections in in_proj_weight (3E, E).  Fold the
    # 1/sqrt(D) scale into Wq/bq (weight-sized op at trace time; no
    # activation-sized pre-scale pass).  No weight transposes: the kernel
    # consumes the (out_features, in_features) layout directly.
    Wq = params["in_proj_weight"][:E] * scale            # (E, E)
    Wk = params["in_proj_weight"][E:2 * E]               # (E, E)
    Wv = params["in_proj_weight"][2 * E:]                # (E, E)
    bq = (params["in_proj_bias"][:E] * scale).reshape(1, E)
    bk = params["in_proj_bias"][E:2 * E].reshape(1, E)
    bv = params["in_proj_bias"][2 * E:].reshape(1, E)
    Wo = params["out_proj_weight"]                       # (E, E)
    bo = params["out_proj_bias"].reshape(1, E)

    # Contiguous (metadata-only, copy-free) folds of (seq, batch) into matmul
    # rows -- no jnp.swapaxes, so no HBM copies around the kernel.
    q2 = query.reshape(L * N, E)
    k2 = key.reshape(S * N, E)
    v2 = value.reshape(S * N, E)

    kernel = functools.partial(
        _mha_fused_kernel, num_heads=H, tgt_len=L, src_len=S, batch=N,
        need_weights=need_weights, matmul_dtype=matmul_dtype)

    vmem = pl.BlockSpec(memory_space=pltpu.MemorySpace.VMEM)   # whole array in VMEM

    out_shape = [jax.ShapeDtypeStruct((L * N, E), jnp.float32)]
    out_specs = [vmem]
    if need_weights:
        # NOTE: last dim S < 128 lanes here -> masked stores; keep S a
        # multiple of 128 (or skip with need_weights=False) at real sizes.
        out_shape.append(jax.ShapeDtypeStruct((N, L, S), jnp.float32))
        out_specs.append(vmem)

    results = pl.pallas_call(
        kernel,
        out_shape=tuple(out_shape),
        in_specs=[vmem] * 11,
        out_specs=tuple(out_specs),
        compiler_params=pltpu.CompilerParams(
            # Trivial at this size; set explicitly so scaled-up tilings don't
            # fall back to the small default scoped limit (esp. v5e's 16 MiB).
            vmem_limit_bytes=32 * 1024 * 1024),
    )(q2, k2, v2, Wq, Wk, Wv, Wo, bq, bk, bv, bo)

    attn_out = results[0].reshape(L, N, E)       # copy-free unfold
    attn_weights = results[1] if need_weights else None
    return attn_out, attn_weights


# --------------------------------- driver ----------------------------------

if __name__ == "__main__":
    EMBED_DIM = 32
    NUM_HEADS = 4
    L, S, N = 8, 8, 2   # target len, source len, batch

    root = jax.random.PRNGKey(0)
    k_q, k_k, k_v, k_w1, k_w2, k_b1, k_b2 = jax.random.split(root, 7)

    query = jax.random.normal(k_q, (L, N, EMBED_DIM), dtype=jnp.float32)
    key = jax.random.normal(k_k, (S, N, EMBED_DIM), dtype=jnp.float32)
    value = jax.random.normal(k_v, (S, N, EMBED_DIM), dtype=jnp.float32)

    # Deterministic parameter init (xavier-ish weights, small non-zero biases
    # so the bias path is actually exercised by the check).
    bound = math.sqrt(6.0 / (EMBED_DIM + EMBED_DIM))
    params = {
        "in_proj_weight": jax.random.uniform(
            k_w1, (3 * EMBED_DIM, EMBED_DIM),
            minval=-bound, maxval=bound, dtype=jnp.float32),
        "in_proj_bias": 0.02 * jax.random.normal(
            k_b1, (3 * EMBED_DIM,), dtype=jnp.float32),
        "out_proj_weight": jax.random.uniform(
            k_w2, (EMBED_DIM, EMBED_DIM),
            minval=-bound, maxval=bound, dtype=jnp.float32),
        "out_proj_bias": 0.02 * jax.random.normal(
            k_b2, (EMBED_DIM,), dtype=jnp.float32),
    }

    fwd = jax.jit(lambda q, k, v: multihead_attention_forward(
        q, k, v, params, NUM_HEADS))
    attn_output, attn_weights = fwd(query, key, value)
    jax.block_until_ready((attn_output, attn_weights))

    # Pure-JAX reference of the same math (PyTorch nn.MultiheadAttention
    # default path), run at HIGHEST matmul precision so the comparison is
    # meaningful on either the interpreter or a real TPU backend.
    def ref(query, key, value):
        E, H = EMBED_DIM, NUM_HEADS
        D = E // H
        P = jax.lax.Precision.HIGHEST
        Wq, Wk, Wv = (params["in_proj_weight"][i * E:(i + 1) * E]
                      for i in range(3))
        bq_, bk_, bv_ = (params["in_proj_bias"][i * E:(i + 1) * E]
                         for i in range(3))
        q = jnp.einsum("lne,fe->lnf", query, Wq, precision=P) + bq_
        k = jnp.einsum("sne,fe->snf", key, Wk, precision=P) + bk_
        v = jnp.einsum("sne,fe->snf", value, Wv, precision=P) + bv_
        q = q * (1.0 / math.sqrt(D))
        q3 = q.reshape(L, N * H, D).transpose(1, 0, 2)
        k3 = k.reshape(S, N * H, D).transpose(1, 0, 2)
        v3 = v.reshape(S, N * H, D).transpose(1, 0, 2)
        s = jnp.einsum("bld,bsd->bls", q3, k3, precision=P)
        w = jax.nn.softmax(s, axis=-1)
        o = jnp.einsum("bls,bsd->bld", w, v3, precision=P)
        o = o.transpose(1, 0, 2).reshape(L, N, E)
        o = jnp.einsum("lne,fe->lnf", o, params["out_proj_weight"],
                       precision=P) + params["out_proj_bias"]
        return o, w.reshape(N, H, L, S).mean(axis=1)

    ro, rw = ref(query, key, value)

    assert attn_output.shape == (L, N, EMBED_DIM)
    assert attn_weights.shape == (N, L, S)
    assert jnp.allclose(attn_output, ro, atol=2e-3, rtol=2e-3), \
        float(jnp.max(jnp.abs(attn_output - ro)))
    assert jnp.allclose(attn_weights, rw, atol=2e-3, rtol=2e-3), \
        float(jnp.max(jnp.abs(attn_weights - rw)))
    # Exact normalisation: returned weights sum to 1 per row.
    assert jnp.allclose(jnp.sum(attn_weights, axis=-1), 1.0, atol=1e-5)

    print("KERNEL_OK")
</pallas_src>

<mosaic_0001>
module attributes {stable_mosaic.version = 11 : i64} {
  func.func @_mha_fused_kernel(%arg0: memref<16x32xf32, #tpu.memory_space<vmem>>, %arg1: memref<16x32xf32, #tpu.memory_space<vmem>>, %arg2: memref<16x32xf32, #tpu.memory_space<vmem>>, %arg3: memref<32x32xf32, #tpu.memory_space<vmem>>, %arg4: memref<32x32xf32, #tpu.memory_space<vmem>>, %arg5: memref<32x32xf32, #tpu.memory_space<vmem>>, %arg6: memref<32x32xf32, #tpu.memory_space<vmem>>, %arg7: memref<1x32xf32, #tpu.memory_space<vmem>>, %arg8: memref<1x32xf32, #tpu.memory_space<vmem>>, %arg9: memref<1x32xf32, #tpu.memory_space<vmem>>, %arg10: memref<1x32xf32, #tpu.memory_space<vmem>>, %arg11: memref<16x32xf32, #tpu.memory_space<vmem>>, %arg12: memref<2x8x8xf32, #tpu.memory_space<vmem>>) attributes {dimension_semantics = [], scalar_prefetch = 0 : i64, scratch_operands = 0 : i64, tpu.core_type = #tpu.core_type<tc>} {
    %c0 = arith.constant 0 : index
    %c0_0 = arith.constant 0 : index
    %0 = vector.load %arg0[%c0, %c0_0] : memref<16x32xf32, #tpu.memory_space<vmem>>, vector<16x32xf32>
    %c0_1 = arith.constant 0 : index
    %c0_2 = arith.constant 0 : index
    %1 = vector.load %arg3[%c0_1, %c0_2] : memref<32x32xf32, #tpu.memory_space<vmem>>, vector<32x32xf32>
    %cst = arith.constant dense<0.000000e+00> : vector<16x32xf32>
    %2 = tpu.matmul %0, %1, %cst {dimension_numbers = #tpu.dot_dimension_numbers<[1], [1], [0], [0], [0, 0, 1, 0], [], []>} : vector<16x32xf32>, vector<32x32xf32>, vector<16x32xf32> -> vector<16x32xf32>
    %c0_3 = arith.constant 0 : index
    %c0_4 = arith.constant 0 : index
    %3 = vector.load %arg7[%c0_3, %c0_4] : memref<1x32xf32, #tpu.memory_space<vmem>>, vector<1x32xf32>
    %4 = vector.broadcast %3 : vector<1x32xf32> to vector<16x32xf32>
    %5 = arith.addf %2, %4 : vector<16x32xf32>
    %c0_5 = arith.constant 0 : index
    %c0_6 = arith.constant 0 : index
    %6 = vector.load %arg1[%c0_5, %c0_6] : memref<16x32xf32, #tpu.memory_space<vmem>>, vector<16x32xf32>
    %c0_7 = arith.constant 0 : index
    %c0_8 = arith.constant 0 : index
    %7 = vector.load %arg4[%c0_7, %c0_8] : memref<32x32xf32, #tpu.memory_space<vmem>>, vector<32x32xf32>
    %cst_9 = arith.constant dense<0.000000e+00> : vector<16x32xf32>
    %8 = tpu.matmul %6, %7, %cst_9 {dimension_numbers = #tpu.dot_dimension_numbers<[1], [1], [0], [0], [0, 0, 1, 0], [], []>} : vector<16x32xf32>, vector<32x32xf32>, vector<16x32xf32> -> vector<16x32xf32>
    %c0_10 = arith.constant 0 : index
    %c0_11 = arith.constant 0 : index
    %9 = vector.load %arg8[%c0_10, %c0_11] : memref<1x32xf32, #tpu.memory_space<vmem>>, vector<1x32xf32>
    %10 = vector.broadcast %9 : vector<1x32xf32> to vector<16x32xf32>
    %11 = arith.addf %8, %10 : vector<16x32xf32>
    %c0_12 = arith.constant 0 : index
    %c0_13 = arith.constant 0 : index
    %12 = vector.load %arg2[%c0_12, %c0_13] : memref<16x32xf32, #tpu.memory_space<vmem>>, vector<16x32xf32>
    %c0_14 = arith.constant 0 : index
    %c0_15 = arith.constant 0 : index
    %13 = vector.load %arg5[%c0_14, %c0_15] : memref<32x32xf32, #tpu.memory_space<vmem>>, vector<32x32xf32>
    %cst_16 = arith.constant dense<0.000000e+00> : vector<16x32xf32>
    %14 = tpu.matmul %12, %13, %cst_16 {dimension_numbers = #tpu.dot_dimension_numbers<[1], [1], [0], [0], [0, 0, 1, 0], [], []>} : vector<16x32xf32>, vector<32x32xf32>, vector<16x32xf32> -> vector<16x32xf32>
    %c0_17 = arith.constant 0 : index
    %c0_18 = arith.constant 0 : index
    %15 = vector.load %arg9[%c0_17, %c0_18] : memref<1x32xf32, #tpu.memory_space<vmem>>, vector<1x32xf32>
    %16 = vector.broadcast %15 : vector<1x32xf32> to vector<16x32xf32>
    %17 = arith.addf %14, %16 : vector<16x32xf32>
    %18 = vector.shape_cast %5 : vector<16x32xf32> to vector<8x2x4x8xf32>
    %19 = tpu.transpose %18, [1, 2, 0, 3] : vector<8x2x4x8xf32> -> vector<2x4x8x8xf32>
    %20 = vector.shape_cast %19 : vector<2x4x8x8xf32> to vector<8x8x8xf32>
    %21 = vector.shape_cast %11 : vector<16x32xf32> to vector<8x2x4x8xf32>
    %22 = tpu.transpose %21, [1, 2, 0, 3] : vector<8x2x4x8xf32> -> vector<2x4x8x8xf32>
    %23 = vector.shape_cast %22 : vector<2x4x8x8xf32> to vector<8x8x8xf32>
    %24 = vector.shape_cast %17 : vector<16x32xf32> to vector<8x2x4x8xf32>
    %25 = tpu.transpose %24, [1, 2, 0, 3] : vector<8x2x4x8xf32> -> vector<2x4x8x8xf32>
    %26 = vector.shape_cast %25 : vector<2x4x8x8xf32> to vector<8x8x8xf32>
    "tpu.trace_start"() <{level = 10 : i32, message = "bld,bsd->bls"}> : () -> ()
    %cst_19 = arith.constant dense<0.000000e+00> : vector<8x8x8xf32>
    %27 = tpu.matmul %20, %23, %cst_19 {dimension_numbers = #tpu.dot_dimension_numbers<[2], [2], [1], [1], [0, 0, 0, 1, 1, 1], [0], [0]>} : vector<8x8x8xf32>, vector<8x8x8xf32>, vector<8x8x8xf32> -> vector<8x8x8xf32>
    "tpu.trace_stop"() : () -> ()
    %cst_20 = arith.constant dense<0xFF800000> : vector<8x8xf32>
    %28 = vector.multi_reduction <maximumf>, %27, %cst_20 [2] : vector<8x8x8xf32> to vector<8x8xf32>
    %29 = vector.shape_cast %28 : vector<8x8xf32> to vector<8x8x1xf32>
    %30 = vector.broadcast %29 : vector<8x8x1xf32> to vector<8x8x8xf32>
    %31 = arith.subf %27, %30 : vector<8x8x8xf32>
    %32 = math.exp %31 : vector<8x8x8xf32>
    %cst_21 = arith.constant dense<0.000000e+00> : vector<8x8xf32>
    %33 = vector.multi_reduction <add>, %32, %cst_21 [2] : vector<8x8x8xf32> to vector<8x8xf32>
    %34 = vector.shape_cast %33 : vector<8x8xf32> to vector<8x8x1xf32>
    %35 = vector.broadcast %34 : vector<8x8x1xf32> to vector<8x8x8xf32>
    %36 = arith.divf %32, %35 : vector<8x8x8xf32>
    "tpu.trace_start"() <{level = 10 : i32, message = "bls,bsd->bld"}> : () -> ()
    %cst_22 = arith.constant dense<0.000000e+00> : vector<8x8x8xf32>
    %37 = tpu.matmul %36, %26, %cst_22 {dimension_numbers = #tpu.dot_dimension_numbers<[2], [1], [1], [2], [0, 0, 0, 1, 1, 2], [0], [0]>} : vector<8x8x8xf32>, vector<8x8x8xf32>, vector<8x8x8xf32> -> vector<8x8x8xf32>
    "tpu.trace_stop"() : () -> ()
    %38 = vector.shape_cast %37 : vector<8x8x8xf32> to vector<2x4x8x8xf32>
    %39 = tpu.transpose %38, [2, 0, 1, 3] : vector<2x4x8x8xf32> -> vector<8x2x4x8xf32>
    %40 = vector.shape_cast %39 : vector<8x2x4x8xf32> to vector<16x32xf32>
    %c0_23 = arith.constant 0 : index
    %c0_24 = arith.constant 0 : index
    %41 = vector.load %arg6[%c0_23, %c0_24] : memref<32x32xf32, #tpu.memory_space<vmem>>, vector<32x32xf32>
    %cst_25 = arith.constant dense<0.000000e+00> : vector<16x32xf32>
    %42 = tpu.matmul %40, %41, %cst_25 {dimension_numbers = #tpu.dot_dimension_numbers<[1], [1], [0], [0], [0, 0, 1, 0], [], []>} : vector<16x32xf32>, vector<32x32xf32>, vector<16x32xf32> -> vector<16x32xf32>
    %c0_26 = arith.constant 0 : index
    %c0_27 = arith.constant 0 : index
    %43 = vector.load %arg10[%c0_26, %c0_27] : memref<1x32xf32, #tpu.memory_space<vmem>>, vector<1x32xf32>
    %44 = vector.broadcast %43 : vector<1x32xf32> to vector<16x32xf32>
    %45 = arith.addf %42, %44 : vector<16x32xf32>
    %c0_28 = arith.constant 0 : index
    %c0_29 = arith.constant 0 : index
    %46 = vector.load %arg11[%c0_28, %c0_29] : memref<16x32xf32, #tpu.memory_space<vmem>>, vector<16x32xf32>
    tpu.vector_store %arg11[%c0_28, %c0_29], %45 {strides = array<i32>} : memref<16x32xf32, #tpu.memory_space<vmem>>, vector<16x32xf32>,
    %47 = vector.shape_cast %36 : vector<8x8x8xf32> to vector<2x4x8x8xf32>
    %cst_30 = arith.constant dense<0.000000e+00> : vector<2x8x8xf32>
    %48 = vector.multi_reduction <add>, %47, %cst_30 [1] : vector<2x4x8x8xf32> to vector<2x8x8xf32>
    %cst_31 = arith.constant 4.000000e+00 : f32
    %49 = vector.broadcast %cst_31 : f32 to vector<2x8x8xf32>
    %50 = arith.divf %48, %49 : vector<2x8x8xf32>
    %c0_32 = arith.constant 0 : index
    %c0_33 = arith.constant 0 : index
    %c0_34 = arith.constant 0 : index
    %51 = vector.load %arg12[%c0_32, %c0_33, %c0_34] : memref<2x8x8xf32, #tpu.memory_space<vmem>>, vector<2x8x8xf32>
    tpu.vector_store %arg12[%c0_32, %c0_33, %c0_34], %50 {strides = array<i32>} : memref<2x8x8xf32, #tpu.memory_space<vmem>>, vector<2x8x8xf32>,
    return
  }
}

</mosaic_0001>

<bundles_post_ra>
// kernel: _lambda_.1
= control target key start
LH: loop header
LB: loop body
LE: loop exit
PB: predicated region body
PF: predicated region fallthrough
CT: control target
= control target key end

     0   :  { %18 = vsyncpa [#allocation3], 0  ;;  %s4133_s0 = inlined_call_operand.hbm [shape: f32[16,32], index: 0, kind: input, shape index: {}]   ;;  %s4134_s1 = inlined_call_operand.hbm [shape: f32[16,32], index: 1, kind: input, shape index: {}]   ;;  %s4135_s2 = inlined_call_operand.hbm [shape: f32[16,32], index: 2, kind: input, shape index: {}]   ;;  %s4136_s3 = inlined_call_operand.hbm [shape: f32[32,32], index: 3, kind: input, shape index: {}]   ;;  %s4137_s4 = inlined_call_operand.hbm [shape: f32[32,32], index: 4, kind: input, shape index: {}]   ;;  %s4138_s5 = inlined_call_operand.hbm [shape: f32[32,32], index: 5, kind: input, shape index: {}]   ;;  %s4139_s6 = inlined_call_operand.hbm [shape: f32[32,32], index: 6, kind: input, shape index: {}]   ;;  %s4140_s7 = inlined_call_operand.vmem [shape: f32[1,32], index: 7, kind: input, shape index: {}]   ;;  %s4141_s8 = inlined_call_operand.vmem [shape: f32[1,32], index: 8, kind: input, shape index: {}]   ;;  %s4142_s9 = inlined_call_operand.vmem [shape: f32[1,32], index: 9, kind: input, shape index: {}]   ;;  %s4143_s10 = inlined_call_operand.vmem [shape: f32[1,32], index: 10, kind: input, shape index: {}]   ;;  %s4144_s11 = inlined_call_operand.hbm [shape: f32[16,32], index: 11, kind: output, shape index: {0}]   ;;  %s4145_s12 = inlined_call_operand.hbm [shape: f32[2,8,8], index: 12, kind: output, shape index: {1}]  }
   0x1   :  { %19 = vsyncpa [#allocation6], 0 }
   0x2   :  { %20 = vsyncpa [#allocation9], 0 }
   0x3   :  { %21 = vsyncpa [#allocation12], 0 }
   0x4   :  { %22 = vsyncpa [#allocation4], 0 }
   0x5   :  { %23 = vsyncpa [#allocation16], 0  ;;  %s3566_s21 = smov [#allocation5]   ;;  %s3567_s23 = smov [#allocation8]  }
   0x6   :  { %s41_s22 = sshll.u32 %s3566_s21, 4  ;;  %s65_s24 = sshll.u32 %s3567_s23, 4  ;;  %s42_s22 = int_to_ptr.vmem [resolvable:$true] %s41_s22  ;;  %s66_s24 = int_to_ptr.vmem [resolvable:$true] %s65_s24 }
   0x7   :  { %s3382_s25 = scalar_lea.vmem %s42_s22, 256  ;;  %p3387_p1 = scmp.lt.s32.totalorder %s42_s22, %s42_s22 }
   0x8   :  { %p3383_p0 = scmp.ne.s32.totalorder %s42_s22, %s3382_s25  ;;  %p3388_p2 = scmp.lt.s32.totalorder %s3382_s25, %s3382_s25 }
   0xa   :  { %p3389_p3 = por %p3388_p2, %p3387_p1 }
   0xc   :  { %p3390_p4 = pnand %p3389_p3, %p3383_p0 }
   0xe   :  { %3393 = shalt.err (!%p3390_p4)
}
   0xf   :  { %s3568_s26 = smov 128   ;;  %s3569_s27 = smov 8  }
  0x10   :  { %47 = dma.hbm_to_vmem [thread:$0]  %s4134_s1, 256, %s42_s22, [#allocation6], %s3568_s26, %s3568_s26, %s3569_s27  }
  0x11   :  { %s3402_s30 = scalar_lea.vmem %s66_s24, 512  ;;  %p3407_p6 = scmp.lt.s32.totalorder %s66_s24, %s66_s24 }
  0x12   :  { %p3403_p5 = scmp.ne.s32.totalorder %s66_s24, %s3402_s30  ;;  %p3408_p7 = scmp.lt.s32.totalorder %s3402_s30, %s3402_s30 }
  0x14   :  { %p3409_p8 = por %p3408_p7, %p3407_p6 }
  0x16   :  { %p3410_p9 = pnand %p3409_p8, %p3403_p5 }
  0x18   :  { %3413 = shalt.err (!%p3410_p9)
}
  0x19   :  { %71 = dma.hbm_to_vmem [thread:$0]  %s4136_s3, 512, %s66_s24, [#allocation9], %s3568_s26, %s3568_s26, %s3569_s27  }
  0x1a   :  { %s3570_s15 = smov [#allocation11]   ;;  %s3571_s17 = smov [#allocation2]  }
  0x1b   :  { %s89_s16 = sshll.u32 %s3570_s15, 4  ;;  %s29_s18 = sshll.u32 %s3571_s17, 4  ;;  %s90_s16 = int_to_ptr.vmem [resolvable:$true] %s89_s16  ;;  %s30_s18 = int_to_ptr.vmem [resolvable:$true] %s29_s18 }
  0x1c   :  { %s3422_s1 = scalar_lea.vmem %s90_s16, 512  ;;  %p3427_p11 = scmp.lt.s32.totalorder %s90_s16, %s90_s16 }
  0x1d   :  { %p3423_p10 = scmp.ne.s32.totalorder %s90_s16, %s3422_s1  ;;  %p3428_p12 = scmp.lt.s32.totalorder %s3422_s1, %s3422_s1 }
  0x1f   :  { %p3429_p13 = por %p3428_p12, %p3427_p11 }
  0x21   :  { %p3430_p0 = pnand %p3429_p13, %p3423_p10 }
  0x23   :  { %3433 = shalt.err (!%p3430_p0)
}
  0x24   :  { %95 = dma.hbm_to_vmem [thread:$0]  %s4138_s5, 512, %s90_s16, [#allocation12], %s3568_s26, %s3568_s26, %s3569_s27  }
  0x25   :  { %s3442_s3 = scalar_lea.vmem %s30_s18, 256  ;;  %p3447_p2 = scmp.lt.s32.totalorder %s30_s18, %s30_s18 }
  0x26   :  { %p3443_p1 = scmp.ne.s32.totalorder %s30_s18, %s3442_s3  ;;  %p3448_p3 = scmp.lt.s32.totalorder %s3442_s3, %s3442_s3 }
  0x28   :  { %p3449_p4 = por %p3448_p3, %p3447_p2 }
  0x2a   :  { %p3450_p5 = pnand %p3449_p4, %p3443_p1 }
  0x2c   :  { %3453 = shalt.err (!%p3450_p5)
}
  0x2d   :  { %35 = dma.hbm_to_vmem [thread:$0]  %s4133_s0, 256, %s30_s18, [#allocation3], %s3568_s26, %s3568_s26, %s3569_s27  }
  0x2e   :  { %s3572_s23 = smov [#allocation7]   ;;  %s3573_s25 = smov [#allocation10]  }
  0x2f   :  { %s53_s24 = sshll.u32 %s3572_s23, 4  ;;  %s77_s28 = sshll.u32 %s3573_s25, 4  ;;  %s54_s24 = int_to_ptr.vmem [resolvable:$true] %s53_s24  ;;  %s78_s28 = int_to_ptr.vmem [resolvable:$true] %s77_s28 }
  0x30   :  { %s3462_s5 = scalar_lea.vmem %s54_s24, 256  ;;  %p3467_p7 = scmp.lt.s32.totalorder %s54_s24, %s54_s24 }
  0x31   :  { %p3463_p6 = scmp.ne.s32.totalorder %s54_s24, %s3462_s5  ;;  %p3468_p8 = scmp.lt.s32.totalorder %s3462_s5, %s3462_s5 }
  0x33   :  { %p3469_p9 = por %p3468_p8, %p3467_p7 }
  0x35   :  { %p3470_p10 = pnand %p3469_p9, %p3463_p6 }
  0x37   :  { %3473 = shalt.err (!%p3470_p10)
}
  0x38   :  { %59 = dma.hbm_to_vmem [thread:$0]  %s4135_s2, 256, %s54_s24, [#allocation6], %s3568_s26, %s3568_s26, %s3569_s27  }
  0x39   :  { %s3482_s0 = scalar_lea.vmem %s78_s28, 512  ;;  %p3487_p12 = scmp.lt.s32.totalorder %s78_s28, %s78_s28 }
  0x3a   :  { %p3483_p11 = scmp.ne.s32.totalorder %s78_s28, %s3482_s0  ;;  %p3488_p13 = scmp.lt.s32.totalorder %s3482_s0, %s3482_s0 }
  0x3c   :  { %p3489_p0 = por %p3488_p13, %p3487_p12 }
  0x3e   :  { %p3490_p1 = pnand %p3489_p0, %p3483_p11 }
  0x40   :  { %3493 = shalt.err (!%p3490_p1)
}
  0x41   :  { %83 = dma.hbm_to_vmem [thread:$0]  %s4137_s4, 512, %s78_s28, [#allocation9], %s3568_s26, %s3568_s26, %s3569_s27  }
  0x42   :  { %s3574_s15 = smov [#allocation13]  }
  0x43   :  { %s101_s16 = sshll.u32 %s3574_s15, 4  ;;  %s102_s16 = int_to_ptr.vmem [resolvable:$true] %s101_s16 }
  0x44   :  { %s3502_s17 = scalar_lea.vmem %s102_s16, 512  ;;  %p3507_p3 = scmp.lt.s32.totalorder %s102_s16, %s102_s16 }
  0x45   :  { %p3503_p2 = scmp.ne.s32.totalorder %s102_s16, %s3502_s17  ;;  %p3508_p4 = scmp.lt.s32.totalorder %s3502_s17, %s3502_s17 }
  0x47   :  { %p3509_p5 = por %p3508_p4, %p3507_p3 }
  0x49   :  { %p3510_p6 = pnand %p3509_p5, %p3503_p2 }
  0x4b   :  { %3513 = shalt.err (!%p3510_p6)
}
  0x4c   :  { %107 = dma.hbm_to_vmem [thread:$0]  %s4139_s6, 512, %s102_s16, [#allocation12], %s3568_s26, %s3568_s26, %s3569_s27  }
  0x4d   :  { %3554 = dma.done.wait [#allocation3], 256  }
  0x4e   :  { %3555 = vsyncadd [#allocation3], 4294967040 }
  0x4f   :  { %3556 = dma.done.wait [#allocation6], 512  }
  0x50   :  { %3557 = vsyncadd [#allocation6], 4294966784 }
  0x51   :  { %3558 = dma.done.wait [#allocation9], 1024  }
  0x52   :  { %3559 = vsyncadd [#allocation9], 4294966272 }
  0x53   :  { %3560 = dma.done.wait [#allocation12], 1024  }
  0x54   :  { %3561 = vsyncadd [#allocation12], 4294966272  ;;  %vm150_vm0 = vcmask 261120   ;;  %v249_v0 = vld [vmem:[#allocation10 + $0x18] sm:$0xff]  ;;  %v248_v1 = vld [vmem:[#allocation10 + $0x10] sm:$0xff]  ;;  %s3575_s1 = smov 112   ;;  %v481_v31 = vlaneseq }
  0x55   :  { %v142_v2 = vld [vmem:[#allocation8 + $0x18] sm:$0xff]  ;;  %3209 = vmatprep.subr.msk.mxu1 %vm150_vm0, %v249_v0  ;;  %v141_v3 = vld [vmem:[#allocation8 + $0x10] sm:$0xff]  ;;  %v244_v4 = vld [vmem:[#allocation5] sm:$0xff]  ;;  %s3576_s19 = smov 120   ;;  %v3578_v22 = vmov 0.0   ;;  %vm3579_vm1 = vmmov 0  }
  0x56   :  { %3198 = vmatprep.subr.msk.mxu0 %vm150_vm0, %v142_v2  ;;  %3210 = vmatpush3.xpose.msk.msra.mxu1 %vm150_vm0, %v249_v0  ;;  %v137_v5 = vld [vmem:[#allocation2] sm:$0xff]  ;;  %v247_v6 = vld [vmem:[#allocation10 + $0x8] sm:$0xff]  ;;  %v246_v8 = vld [vmem:[#allocation10] sm:$0xff]  ;;  %v3580_v29 = vmov 1983009808   ;;  %v482_v33 = vshrl.u32 %v481_v31, 7 }
  0x57   :  { %3199 = vmatpush3.xpose.msk.msra.mxu0 %vm150_vm0, %v142_v2  ;;  %3211 = vmatprep.subr.msk.mxu1 %vm150_vm0, %v248_v1  ;;  %v140_v7 = vld [vmem:[#allocation8 + $0x8] sm:$0xff]  ;;  %v139_v9 = vld [vmem:[#allocation8] sm:$0xff]  ;;  %v138_v11 = vld [vmem:[#allocation2 + $0x8] sm:$0xff]  ;;  %v479_v30 = vunpack.c.l.s4 %v3580_v29  ;;  %v3581_v36 = vmov 1934713408   ;;  %vm1332_vm2 = vcmask 64512  }
  0x58   :  { %3200 = vmatprep.subr.msk.mxu0 %vm150_vm0, %v141_v3  ;;  %3217 = vmatprep.mubr.msk.f32.mxu1 %vm150_vm0, %v244_v4  ;;  %v245_v10 = vld [vmem:[#allocation5 + $0x8] sm:$0xff]  ;;  %v3085_v12 = vld [vmem:[%s4141_s8] ss:$0 sm:$0xff]  ;;  %s3577_s8 = smov 104   ;;  %v355_v23 = vld [vmem:[#allocation11 + $0x18] sm:$0xff]  ;;  %v511_v37 = vunpack.c.l.s4 %v3581_v36  ;;  %s3583_s22 = smov 24  }
  0x59   :  { %3206 = vmatprep.mubr.msk.f32.mxu0 %vm150_vm0, %v137_v5  ;;  %v3078_v16 = vld [vmem:[%s4140_s7] ss:$0 sm:$0xff]  ;;  %v353_v26 = vld [vmem:[#allocation11 + $0x8] sm:$0xff]  ;;  %v352_v27 = vld [vmem:[#allocation11] sm:$0xff]  ;;  %v480_v32 = vunpack.c.0.s8 %v479_v30  ;;  %vm2911_vm3 = vcmask 130048   ;;  %vm2914_vm4 = vcmask 195584  }
  0x5a   :  { %3212 = vmatpush3.xpose.msk.msra.mxu1 %vm150_vm0, %v248_v1  ;;  %v354_v24 = vld [vmem:[#allocation11 + $0x10] sm:$0xff]  ;;  %v351_v28 = vld [vmem:[#allocation7 + $0x8] sm:$0xff]  ;;  %v512_v41 = vunpack.c.0.s8 %v511_v37  ;;  %s3584_s23 = smov [#allocation15]  }
  0x5b   :  { %3201 = vmatpush3.xpose.msk.msra.mxu0 %vm150_vm0, %v141_v3  ;;  %3213 = vmatprep.subr.msk.mxu1 %vm150_vm0, %v247_v6  ;;  %v350_v25 = vld [vmem:[#allocation7] sm:$0xff]  ;;  %v3767_v38 = vsub.s32 %v480_v32, %v482_v33  ;;  %s3059_s24 = sshll.u32 %s3584_s23, 4  ;;  %s3060_s24 = int_to_ptr.vmem [resolvable:$true] %s3059_s24 }
  0x5c   :  { %3202 = vmatprep.subr.msk.mxu0 %vm150_vm0, %v140_v7  ;;  %v3775_v50 = vsub.s32 %v512_v41, %v482_v33  ;;  %s3514_s25 = scalar_lea.vmem %s3060_s24, 256  ;;  %p3519_p8 = scmp.lt.s32.totalorder %s3060_s24, %s3060_s24 }
  0x5d   :  { %p3515_p7 = scmp.ne.s32.totalorder %s3060_s24, %s3514_s25  ;;  %p3520_p9 = scmp.lt.s32.totalorder %s3514_s25, %s3514_s25 }
  0x5e   :  { %3214 = vmatpush3.xpose.msk.msra.mxu1 %vm150_vm0, %v247_v6 }
  0x5f   :  { %3203 = vmatpush3.xpose.msk.msra.mxu0 %vm150_vm0, %v140_v7  ;;  %3215 = vmatprep.subr.msk.mxu1 %vm150_vm0, %v246_v8  ;;  %p3521_p10 = por %p3520_p9, %p3519_p8 }
  0x60   :  { %3204 = vmatprep.subr.msk.mxu0 %vm150_vm0, %v139_v9 }
  0x61   :  { %p3522_p11 = pnand %p3521_p10, %p3515_p7 }
  0x62   :  { %3216 = vmatpush3.xpose.msk.msra.mxu1 %vm150_vm0, %v246_v8 }
  0x63   :  { %3205 = vmatpush3.xpose.msk.msra.mxu0 %vm150_vm0, %v139_v9  ;;  %3231 = vmatprep.subr.mxu1 %v3578_v22 }
  0x64   :  { %3220 = vmatprep.subr.msk.mxu0 %vm150_vm0, %v355_v23 }
  0x65   :  { %3218 = vmatmul.mubr.msk.f32.vlgmr.msra.gmra.mxu1 %vm150_vm0, %v245_v10 }
  0x66   :  { %3207 = vmatmul.mubr.msk.f32.vlgmr.msra.gmra.mxu0 %vm150_vm0, %v138_v11  ;;  %3233 = vmatprep.mubr.msk.f32.mxu1 %vm3579_vm1, %v3578_v22 }
  0x67   :  { %3221 = vmatpush3.xpose.msk.msra.mxu0 %vm150_vm0, %v355_v23  ;;  %3228 = vmatprep.mubr.msk.f32.mxu0 %vm150_vm0, %v350_v25 }
  0x68   :  { %3222 = vmatprep.subr.msk.mxu0 %vm150_vm0, %v354_v24 }
  0x6b   :  { %3223 = vmatpush3.xpose.msk.msra.mxu0 %vm150_vm0, %v354_v24 }
  0x6c   :  { %3224 = vmatprep.subr.msk.mxu0 %vm150_vm0, %v353_v26 }
  0x6f   :  { %3225 = vmatpush3.xpose.msk.msra.mxu0 %vm150_vm0, %v353_v26 }
  0x70   :  { %3226 = vmatprep.subr.msk.mxu0 %vm150_vm0, %v352_v27 }
  0x73   :  { %3227 = vmatpush3.xpose.msk.msra.mxu0 %vm150_vm0, %v352_v27 }
  0x74   :  { %3271 = vmatprep.subr.mxu0 %v3578_v22 }
  0x76   :  { %3229 = vmatmul.mubr.msk.f32.vlgmr.msra.gmra.mxu0 %vm150_vm0, %v351_v28 }
  0x77   :  { %3273 = vmatprep.mubr.msk.f32.mxu0 %vm3579_vm1, %v3578_v22 }
 0x125   :  { %v3219_v13 = vpop.f32.mrf.mxu1 }
 0x126   :  { %v3716_v14 = vadd.f32 %v3219_v13, %v3085_v12  ;;  %v3208_v18 = vpop.f32.mrf.mxu0 }
 0x127   :  { %v341_v15 = vpop.f32.mrf.mxu1  ;;  %v3727_v19 = vadd.f32 %v3208_v18, %v3078_v16 }
 0x128   :  { %758 = vrot.lane.b32.xlu1 %v3716_v14, %s3575_s1  ;;  %752 = vrot.lane.b32.xlu0 %v3716_v14, %s3576_s19  ;;  %v3725_v17 = vadd.f32 %v3085_v12, %v341_v15  ;;  %v235_v20 = vpop.f32.mrf.mxu0 }
 0x129   :  { %v3737_v21 = vadd.f32 %v3078_v16, %v235_v20 }
 0x12c   :  { %764 = vrot.lane.b32.xlu1 %v3716_v14, %s3577_s8  ;;  %750 = vrot.lane.b32.xlu0 %v3725_v17, %s3576_s19 }
 0x130   :  { %762 = vrot.lane.b32.xlu0 %v3725_v17, %s3577_s8  ;;  %460 = vrot.lane.b32.xlu1 %v3727_v19, %s3576_s19 }
 0x134   :  { %466 = vrot.lane.b32.xlu1 %v3727_v19, %s3575_s1  ;;  %458 = vrot.lane.b32.xlu0 %v3737_v21, %s3576_s19 }
 0x138   :  { %756 = vrot.lane.b32.xlu1 %v3725_v17, %s3575_s1  ;;  %464 = vrot.lane.b32.xlu0 %v3737_v21, %s3575_s1 }
 0x13c   :  { %472 = vrot.lane.b32.xlu1 %v3727_v19, %s3577_s8  ;;  %470 = vrot.lane.b32.xlu0 %v3737_v21, %s3577_s8 }
 0x19a   :  { %v759_v34 = vpop.permute.xlu1 %758  ;;  %v753_v35 = vpop.permute.xlu0 %752 }
 0x19b   :  { %v836_v39 = vcombine.low %v3716_v14, %v759_v34  ;;  %v837_v40 = vcombine.high %v3716_v14, %v759_v34 }
 0x19d   :  { %v844_v46 = vrot.slane %v836_v39, %v3767_v38  ;;  %v851_v47 = vrot.slane %v837_v40, %v3767_v38 }
 0x19e   :  { %v765_v42 = vpop.permute.xlu1 %764  ;;  %v751_v43 = vpop.permute.xlu0 %750 }
 0x19f   :  { %v852_v44 = vcombine.low %v753_v35, %v765_v42  ;;  %v853_v45 = vcombine.high %v753_v35, %v765_v42 }
 0x1a1   :  { %v860_v48 = vrot.slane %v852_v44, %v3767_v38  ;;  %v867_v49 = vrot.slane %v853_v45, %v3767_v38 }
 0x1a2   :  { %v763_v51 = vpop.permute.xlu0 %762  ;;  %v461_v52 = vpop.permute.xlu1 %460 }
 0x1a3   :  { %v868_v53 = vcombine.low %v844_v46, %v860_v48  ;;  %v869_v54 = vcombine.high %v844_v46, %v860_v48  ;;  %v884_v55 = vcombine.low %v851_v47, %v867_v49  ;;  %v885_v56 = vcombine.high %v851_v47, %v867_v49 }
 0x1a4   :  { %v784_v63 = vcombine.low %v751_v43, %v763_v51  ;;  %v785_v0 = vcombine.high %v751_v43, %v763_v51 }
 0x1a5   :  { %v3778_v57 = vrot.slane %v868_v53, %v3775_v50  ;;  %v3781_v58 = vrot.slane %v869_v54, %v3775_v50  ;;  %v3784_v59 = vrot.slane %v884_v55, %v3775_v50  ;;  %v3787_v60 = vrot.slane %v885_v56, %v3775_v50 }
 0x1a6   :  { %v467_v61 = vpop.permute.xlu1 %466  ;;  %v459_v62 = vpop.permute.xlu0 %458  ;;  %v792_v9 = vrot.slane %v784_v63, %v3767_v38  ;;  %v799_v10 = vrot.slane %v785_v0, %v3767_v38 }
 0x1a7   :  { %v920_v1 = vcombine.low %v3778_v57, %v3784_v59  ;;  %v928_v2 = vcombine.low %v3781_v58, %v3787_v60  ;;  %v544_v5 = vcombine.low %v3727_v19, %v467_v61  ;;  %v545_v6 = vcombine.high %v3727_v19, %v467_v61 }
 0x1a9   :  { %v3800_v11 = vrot.slane %v920_v1, %v3767_v38  ;;  %v3803_v12 = vrot.slane %v928_v2, %v3767_v38  ;;  %v552_v18 = vrot.slane %v544_v5, %v3767_v38 }
 0x1aa   :  { %v757_v3 = vpop.permute.xlu1 %756  ;;  %v465_v4 = vpop.permute.xlu0 %464 }
 0x1ab   :  { %v768_v7 = vcombine.low %v3725_v17, %v757_v3  ;;  %v769_v8 = vcombine.high %v3725_v17, %v757_v3  ;;  %v559_v17 = vrot.slane %v545_v6, %v3767_v38  ;;  %v476_v42 = vcombine.low %v3737_v21, %v465_v4 }
 0x1ac   :  { %v477_v43 = vcombine.high %v3737_v21, %v465_v4  ;;  %v952_v56 = vcombine.low %v3800_v11, %v3803_v12 }
 0x1ad   :  { %v776_v13 = vrot.slane %v768_v7, %v3767_v38  ;;  %v783_v14 = vrot.slane %v769_v8, %v3767_v38  ;;  %v484_v21 = vrot.slane %v476_v42, %v3767_v38 }
 0x1ae   :  { %v473_v15 = vpop.permute.xlu1 %472  ;;  %v471_v16 = vpop.permute.xlu0 %470  ;;  %v491_v55 = vrot.slane %v477_v43, %v3767_v38 }
 0x1af   :  { %v560_v19 = vcombine.low %v461_v52, %v473_v15  ;;  %v561_v20 = vcombine.high %v461_v52, %v473_v15  ;;  %v800_v23 = vcombine.low %v776_v13, %v792_v9  ;;  %v801_v24 = vcombine.high %v776_v13, %v792_v9 }
 0x1b0   :  { %v816_v25 = vcombine.low %v783_v14, %v799_v10  ;;  %v817_v26 = vcombine.high %v783_v14, %v799_v10  ;;  %v492_v29 = vcombine.low %v459_v62, %v471_v16  ;;  %v493_v30 = vcombine.high %v459_v62, %v471_v16 }
 0x1b1   :  { %v568_v27 = vrot.slane %v560_v19, %v3767_v38  ;;  %v575_v28 = vrot.slane %v561_v20, %v3767_v38  ;;  %v3812_v31 = vrot.slane %v800_v23, %v3775_v50  ;;  %v3815_v32 = vrot.slane %v801_v24, %v3775_v50 }
 0x1b2   :  { %v824_v33 = vrot.slane %v816_v25, %v3775_v50  ;;  %v831_v34 = vrot.slane %v817_v26, %v3775_v50  ;;  %v500_v51 = vrot.slane %v492_v29, %v3767_v38  ;;  %v507_v52 = vrot.slane %v493_v30, %v3767_v38 }
 0x1b3   :  { %v576_v35 = vcombine.low %v552_v18, %v568_v27  ;;  %v577_v36 = vcombine.high %v552_v18, %v568_v27  ;;  %v592_v37 = vcombine.low %v559_v17, %v575_v28  ;;  %v593_v39 = vcombine.high %v559_v17, %v575_v28 }
 0x1b4   :  { %v904_v40 = vcombine.low %v3812_v31, %v824_v33  ;;  %v912_v41 = vcombine.low %v3815_v32, %v831_v34  ;;  %v508_v0 = vcombine.low %v484_v21, %v500_v51  ;;  %v509_v1 = vcombine.high %v484_v21, %v500_v51 }
 0x1b5   :  { %v584_v44 = vrot.slane %v576_v35, %v3775_v50  ;;  %v591_v45 = vrot.slane %v577_v36, %v3775_v50  ;;  %v600_v46 = vrot.slane %v592_v37, %v3775_v50  ;;  %v607_v47 = vrot.slane %v593_v39, %v3775_v50 }
 0x1b6   :  { %v911_v48 = vrot.slane %v904_v40, %v3767_v38  ;;  %v919_v49 = vrot.slane %v912_v41, %v3767_v38  ;;  %v524_v2 = vcombine.low %v491_v55, %v507_v52  ;;  %v525_v3 = vcombine.high %v491_v55, %v507_v52 }
 0x1b7   :  { %v628_v53 = vcombine.low %v584_v44, %v600_v46  ;;  %v636_v54 = vcombine.low %v591_v45, %v607_v47  ;;  %v516_v4 = vrot.slane %v508_v0, %v3775_v50  ;;  %v523_v5 = vrot.slane %v509_v1, %v3775_v50 }
 0x1b8   :  { %v936_v61 = vcombine.low %v911_v48, %v919_v49  ;;  %v532_v6 = vrot.slane %v524_v2, %v3775_v50  ;;  %v539_v7 = vrot.slane %v525_v3, %v3775_v50  ;;  %v960_v9 = vrot.slane %v952_v56, %v3775_v50 }
 0x1b9   :  { %v635_v62 = vrot.slane %v628_v53, %v3767_v38  ;;  %v643_v63 = vrot.slane %v636_v54, %v3767_v38  ;;  %v937_v20 = vcombine.high %v911_v48, %v919_v49  ;;  %v3103_v23 = vcombine.high %v3812_v31, %v824_v33 }
 0x1ba   :  { %v944_v8 = vrot.slane %v936_v61, %v3775_v50  ;;  %v612_v13 = vcombine.low %v516_v4, %v532_v6  ;;  %v620_v14 = vcombine.low %v523_v5, %v539_v7  ;;  %v3104_v24 = vcombine.high %v3815_v32, %v831_v34 }
 0x1bb   :  { %v660_v10 = vcombine.low %v635_v62, %v643_v63  ;;  %v953_v25 = vcombine.high %v3800_v11, %v3803_v12  ;;  %v3105_v26 = vcombine.high %v3778_v57, %v3784_v59  ;;  %v3106_v27 = vcombine.high %v3781_v58, %v3787_v60 }
 0x1bc   :  { %v968_v15 = vcombine.low %v944_v8, %v960_v9  ;;  %v619_v16 = vrot.slane %v612_v13, %v3767_v38  ;;  %v627_v18 = vrot.slane %v620_v14, %v3767_v38  ;;  %v661_v29 = vcombine.high %v635_v62, %v643_v63 }
 0x1bd   :  { %v668_v19 = vrot.slane %v660_v10, %v3775_v50  ;;  %v3101_v30 = vcombine.high %v584_v44, %v600_v46  ;;  %v3102_v35 = vcombine.high %v591_v45, %v607_v47  ;;  %v3099_v37 = vcombine.high %v516_v4, %v532_v6 }
 0x1be   :  { %3232 = vmatpush3.xpose.msk.msra.mxu1 %vm1332_vm2, %v968_v15  ;;  %v644_v17 = vcombine.low %v619_v16, %v627_v18  ;;  %v645_v36 = vcombine.high %v619_v16, %v627_v18  ;;  %v3100_v39 = vcombine.high %v523_v5, %v539_v7  ;;  %v979_v32 = vrot.slane %v3103_v23, %v3767_v38 }
 0x1bf   :  { %3236 = vmatprep.subr.mxu1 %v3578_v22  ;;  %v987_v33 = vrot.slane %v3104_v24, %v3767_v38  ;;  %v969_v11 = vcombine.high %v944_v8, %v960_v9  ;;  %v951_v12 = vrot.slane %v937_v20, %v3775_v50  ;;  %v995_v57 = vrot.slane %v3105_v26, %v3767_v38 }
 0x1c0   :  { %v652_v28 = vrot.slane %v644_v17, %v3775_v50  ;;  %v1003_v58 = vrot.slane %v3106_v27, %v3767_v38  ;;  %v967_v59 = vrot.slane %v953_v25, %v3775_v50  ;;  %v703_v60 = vrot.slane %v3101_v30, %v3767_v38 }
 0x1c1   :  { %v711_v34 = vrot.slane %v3102_v35, %v3767_v38  ;;  %v675_v40 = vrot.slane %v661_v29, %v3775_v50  ;;  %v687_v41 = vrot.slane %v3099_v37, %v3767_v38  ;;  %v695_v42 = vrot.slane %v3100_v39, %v3767_v38 }
 0x1c2   :  { %v676_v31 = vcombine.low %v652_v28, %v668_v19  ;;  %v677_v43 = vcombine.high %v652_v28, %v668_v19  ;;  %v659_v44 = vrot.slane %v645_v36, %v3775_v50  ;;  %v1004_v45 = vcombine.low %v979_v32, %v987_v33 }
 0x1c3   :  { %v970_v46 = vcombine.low %v951_v12, %v967_v59  ;;  %v1020_v47 = vcombine.low %v995_v57, %v1003_v58  ;;  %v728_v48 = vcombine.low %v703_v60, %v711_v34  ;;  %v712_v49 = vcombine.low %v687_v41, %v695_v42 }
 0x1c4   :  { %3234 = vmatmul.mubr.msk.f32.vlgmr.msra.gmra.mxu1 %vm1332_vm2, %v676_v31  ;;  %v678_v51 = vcombine.low %v659_v44, %v675_v40  ;;  %v971_v52 = vcombine.high %v951_v12, %v967_v59  ;;  %v1012_v53 = vrot.slane %v1004_v45, %v3775_v50  ;;  %v679_v21 = vcombine.high %v659_v44, %v675_v40  ;;  %v3092_v59 = vld [vmem:[%s4142_s9] ss:$0 sm:$0xff]  ;;  %s3582_s9 = smov 16  }
 0x1c5   :  { %3237 = vmatpush3.xpose.msk.msra.mxu1 %vm1332_vm2, %v969_v11  ;;  %3238 = vmatprep.mubr.msk.f32.mxu1 %vm3579_vm1, %v3578_v22  ;;  %v1028_v54 = vrot.slane %v1020_v47, %v3775_v50  ;;  %v720_v55 = vrot.slane %v712_v49, %v3775_v50  ;;  %v736_v56 = vrot.slane %v728_v48, %v3775_v50 }
 0x1c6   :  { %3241 = vmatprep.subr.mxu1 %v3578_v22  ;;  %v1005_v61 = vcombine.high %v979_v32, %v987_v33  ;;  %v1021_v63 = vcombine.high %v995_v57, %v1003_v58  ;;  %v729_v0 = vcombine.high %v703_v60, %v711_v34  ;;  %v713_v1 = vcombine.high %v687_v41, %v695_v42  ;;  %v3230_v58 = vpop.f32.mrf.mxu0 }
 0x1c7   :  { %v1036_v62 = vcombine.low %v1012_v53, %v1028_v54  ;;  %v744_v2 = vcombine.low %v720_v55, %v736_v56  ;;  %v1037_v3 = vcombine.high %v1012_v53, %v1028_v54  ;;  %v745_v6 = vcombine.high %v720_v55, %v736_v56 }
 0x1c8   :  { %3239 = vmatmul.mubr.msk.f32.vlgmr.msra.gmra.mxu1 %vm1332_vm2, %v677_v43  ;;  %v1019_v4 = vrot.slane %v1005_v61, %v3775_v50  ;;  %v1035_v5 = vrot.slane %v1021_v63, %v3775_v50  ;;  %v727_v7 = vrot.slane %v713_v1, %v3775_v50  ;;  %v743_v8 = vrot.slane %v729_v0, %v3775_v50  ;;  %v447_v60 = vpop.f32.mrf.mxu0 }
 0x1c9   :  { %3242 = vmatpush3.xpose.msk.msra.mxu1 %vm1332_vm2, %v970_v46  ;;  %3243 = vmatprep.mubr.msk.f32.mxu1 %vm3579_vm1, %v3578_v22  ;;  %v3926_v34 = vadd.f32 %v3092_v59, %v447_v60  ;;  %v3932_v40 = vadd.f32 %v3230_v58, %v3092_v59 }
 0x1ca   :  { %3246 = vmatprep.subr.mxu1 %v3578_v22  ;;  %v1038_v9 = vcombine.low %v1019_v4, %v1035_v5  ;;  %v746_v10 = vcombine.low %v727_v7, %v743_v8  ;;  %v1039_v13 = vcombine.high %v1019_v4, %v1035_v5  ;;  %v747_v14 = vcombine.high %v727_v7, %v743_v8 }
 0x1cc   :  { %3244 = vmatmul.mubr.msk.f32.vlgmr.msra.gmra.mxu1 %vm1332_vm2, %v678_v51 }
 0x1cd   :  { %3247 = vmatpush3.xpose.msk.msra.mxu1 %vm1332_vm2, %v971_v52  ;;  %3248 = vmatprep.mubr.msk.f32.mxu1 %vm3579_vm1, %v3578_v22 }
 0x1ce   :  { %3251 = vmatprep.subr.mxu1 %v3578_v22 }
 0x1d0   :  { %3249 = vmatmul.mubr.msk.f32.vlgmr.msra.gmra.mxu1 %vm1332_vm2, %v679_v21 }
 0x1d1   :  { %3252 = vmatpush3.xpose.msk.msra.mxu1 %vm1332_vm2, %v1036_v62  ;;  %3253 = vmatprep.mubr.msk.f32.mxu1 %vm3579_vm1, %v3578_v22 }
 0x1d2   :  { %3256 = vmatprep.subr.mxu1 %v3578_v22 }
 0x1d4   :  { %3254 = vmatmul.mubr.msk.f32.vlgmr.msra.gmra.mxu1 %vm1332_vm2, %v744_v2 }
 0x1d5   :  { %3257 = vmatpush3.xpose.msk.msra.mxu1 %vm1332_vm2, %v1037_v3  ;;  %3258 = vmatprep.mubr.msk.f32.mxu1 %vm3579_vm1, %v3578_v22 }
 0x1d6   :  { %3261 = vmatprep.subr.mxu1 %v3578_v22 }
 0x1d8   :  { %3259 = vmatmul.mubr.msk.f32.vlgmr.msra.gmra.mxu1 %vm1332_vm2, %v745_v6 }
 0x1d9   :  { %3262 = vmatpush3.xpose.msk.msra.mxu1 %vm1332_vm2, %v1038_v9  ;;  %3263 = vmatprep.mubr.msk.f32.mxu1 %vm3579_vm1, %v3578_v22 }
 0x1da   :  { %3266 = vmatprep.subr.mxu1 %v3578_v22 }
 0x1dc   :  { %3264 = vmatmul.mubr.msk.f32.vlgmr.msra.gmra.mxu1 %vm1332_vm2, %v746_v10 }
 0x1dd   :  { %3267 = vmatpush3.xpose.msk.msra.mxu1 %vm1332_vm2, %v1039_v13  ;;  %3268 = vmatprep.mubr.msk.f32.mxu1 %vm3579_vm1, %v3578_v22 }
 0x1de   :  { %3276 = vmatprep.subr.mxu1 %v3578_v22 }
 0x1e0   :  { %3269 = vmatmul.mubr.msk.f32.vlgmr.msra.gmra.mxu1 %vm1332_vm2, %v747_v14 }
 0x1e1   :  { %3278 = vmatprep.mubr.msk.f32.mxu1 %vm3579_vm1, %v3578_v22 }
 0x284   :  { %v1405_v15 = vpop.f32.mrf.mxu1 }
 0x285   :  { %v1941_v16 = vsel %vm1332_vm2, %v1405_v15, -inf }
 0x286   :  { %1942 = vmax.xlane.f32.xlu0 %v1941_v16  ;;  %v3235_v18 = vpop.f32.mrf.mxu1 }
 0x288   :  { %v1481_v17 = vpop.f32.mrf.mxu1 }
 0x289   :  { %v1944_v19 = vsel %vm1332_vm2, %v1481_v17, -inf }
 0x28a   :  { %1945 = vmax.xlane.f32.xlu1 %v1944_v19  ;;  %v3240_v20 = vpop.f32.mrf.mxu1 }
 0x28c   :  { %v1557_v23 = vpop.f32.mrf.mxu1 }
 0x28d   :  { %v1947_v24 = vsel %vm1332_vm2, %v1557_v23, -inf }
 0x28e   :  { %1948 = vmax.xlane.f32.xlu0 %v1947_v24  ;;  %v3245_v25 = vpop.f32.mrf.mxu1 }
 0x290   :  { %v1633_v26 = vpop.f32.mrf.mxu1 }
 0x291   :  { %v1950_v27 = vsel %vm1332_vm2, %v1633_v26, -inf }
 0x292   :  { %1951 = vmax.xlane.f32.xlu0 %v1950_v27  ;;  %v3250_v28 = vpop.f32.mrf.mxu1 }
 0x294   :  { %v1709_v29 = vpop.f32.mrf.mxu1 }
 0x295   :  { %v1953_v30 = vsel %vm1332_vm2, %v1709_v29, -inf }
 0x296   :  { %1954 = vmax.xlane.f32.xlu1 %v1953_v30  ;;  %v3255_v35 = vpop.f32.mrf.mxu1 }
 0x298   :  { %v1785_v36 = vpop.f32.mrf.mxu1 }
 0x299   :  { %v1956_v37 = vsel %vm1332_vm2, %v1785_v36, -inf }
 0x29a   :  { %1957 = vmax.xlane.f32.xlu0 %v1956_v37  ;;  %v3260_v39 = vpop.f32.mrf.mxu1 }
 0x29c   :  { %v1861_v31 = vpop.f32.mrf.mxu1 }
 0x29d   :  { %v1959_v32 = vsel %vm1332_vm2, %v1861_v31, -inf }
 0x29e   :  { %1960 = vmax.xlane.f32.xlu1 %v1959_v32  ;;  %v3265_v33 = vpop.f32.mrf.mxu1 }
 0x2a0   :  { %v1937_v11 = vpop.f32.mrf.mxu1 }
 0x2a1   :  { %v1962_v12 = vsel %vm1332_vm2, %v1937_v11, -inf }
 0x2a2   :  { %1963 = vmax.xlane.f32.xlu0 %v1962_v12  ;;  %v3270_v57 = vpop.f32.mrf.mxu1 }
 0x2af   :  { %1042 = vrot.lane.b32.xlu1 %v3926_v34, %s3576_s19 }
 0x2b3   :  { %1048 = vrot.lane.b32.xlu1 %v3926_v34, %s3575_s1 }
 0x2b7   :  { %1050 = vrot.lane.b32.xlu1 %v3932_v40, %s3575_s1 }
 0x2b8   :  { %1044 = vrot.lane.b32.xlu0 %v3932_v40, %s3576_s19 }
 0x2bb   :  { %1056 = vrot.lane.b32.xlu1 %v3932_v40, %s3577_s8 }
 0x2bc   :  { %1054 = vrot.lane.b32.xlu0 %v3926_v34, %s3577_s8 }
 0x30f   :  { %v1943_v41 = vpop.xlane.xlu0 %1942 }
 0x310   :  { %v1965_v42 = vsub.f32 %v1405_v15, %v1943_v41 }
 0x312   :  { %v1973_v43 = vmul.f32 1.442695, %v1965_v42 }
 0x313   :  { %v1946_v44 = vpop.xlane.xlu1 %1945 }
 0x314   :  { %3342 = vpow2.f32 %v1973_v43  ;;  %v1966_v45 = vsub.f32 %v1481_v17, %v1946_v44 }
 0x316   :  { %v1975_v46 = vmul.f32 1.442695, %v1966_v45 }
 0x317   :  { %v1949_v47 = vpop.xlane.xlu0 %1948 }
 0x318   :  { %3344 = vpow2.f32 %v1975_v46  ;;  %v1967_v48 = vsub.f32 %v1557_v23, %v1949_v47 }
 0x31a   :  { %v1977_v49 = vmul.f32 1.442695, %v1967_v48 }
 0x31b   :  { %v1952_v51 = vpop.xlane.xlu0 %1951 }
 0x31c   :  { %3346 = vpow2.f32 %v1977_v49  ;;  %v1968_v52 = vsub.f32 %v1633_v26, %v1952_v51 }
 0x31e   :  { %v1979_v53 = vmul.f32 1.442695, %v1968_v52 }
 0x31f   :  { %v1955_v54 = vpop.xlane.xlu1 %1954 }
 0x320   :  { %3348 = vpow2.f32 %v1979_v53  ;;  %v1969_v21 = vsub.f32 %v1709_v29, %v1955_v54 }
 0x321   :  { %v3942_v55 = vpop.eup %3342 }
 0x322   :  { %v1981_v56 = vmul.f32 1.442695, %v1969_v21  ;;  %v1989_v61 = vsel %vm1332_vm2, %v3942_v55, 0.0 }
 0x323   :  { %v1958_v62 = vpop.xlane.xlu0 %1957  ;;  %1990 = vadd.xlane.f32.xlu1 %v1989_v61 }
 0x324   :  { %3350 = vpow2.f32 %v1981_v56  ;;  %v1970_v63 = vsub.f32 %v1785_v36, %v1958_v62 }
 0x325   :  { %v3946_v0 = vpop.eup %3344 }
 0x326   :  { %v1983_v1 = vmul.f32 1.442695, %v1970_v63  ;;  %v1992_v2 = vsel %vm1332_vm2, %v3946_v0, 0.0 }
 0x327   :  { %v1961_v3 = vpop.xlane.xlu1 %1960  ;;  %1993 = vadd.xlane.f32.xlu0 %v1992_v2 }
 0x328   :  { %3352 = vpow2.f32 %v1983_v1  ;;  %v1971_v4 = vsub.f32 %v1861_v31, %v1961_v3 }
 0x329   :  { %v3950_v5 = vpop.eup %3346 }
 0x32a   :  { %v1985_v6 = vmul.f32 1.442695, %v1971_v4  ;;  %v1995_v7 = vsel %vm1332_vm2, %v3950_v5, 0.0 }
 0x32b   :  { %1996 = vadd.xlane.f32.xlu1 %v1995_v7  ;;  %v1043_v8 = vpop.permute.xlu1 %1042  ;;  %v1964_v9 = vpop.xlane.xlu0 %1963 }
 0x32c   :  { %3354 = vpow2.f32 %v1985_v6  ;;  %v1972_v10 = vsub.f32 %v1937_v11, %v1964_v9 }
 0x32d   :  { %v3954_v13 = vpop.eup %3348 }
 0x32e   :  { %v1987_v14 = vmul.f32 1.442695, %v1972_v10  ;;  %v1998_v15 = vsel %vm1332_vm2, %v3954_v13, 0.0 }
 0x32f   :  { %v1049_v16 = vpop.permute.xlu1 %1048  ;;  %1999 = vadd.xlane.f32.xlu0 %v1998_v15  ;;  %v1045_v18 = vpop.permute.xlu0 %1044 }
 0x330   :  { %3356 = vpow2.f32 %v1987_v14  ;;  %v1060_v19 = vcombine.low %v3926_v34, %v1049_v16  ;;  %v1061_v20 = vcombine.high %v3926_v34, %v1049_v16 }
 0x331   :  { %v3958_v17 = vpop.eup %3350 }
 0x332   :  { %v2001_v23 = vsel %vm1332_vm2, %v3958_v17, 0.0  ;;  %v1068_v30 = vrot.slane %v1060_v19, %v3767_v38  ;;  %v1075_v35 = vrot.slane %v1061_v20, %v3767_v38 }
 0x333   :  { %2002 = vadd.xlane.f32.xlu1 %v2001_v23  ;;  %v1051_v24 = vpop.permute.xlu1 %1050  ;;  %v1055_v25 = vpop.permute.xlu0 %1054 }
 0x334   :  { %v1076_v26 = vcombine.low %v1043_v8, %v1055_v25  ;;  %v1077_v27 = vcombine.high %v1043_v8, %v1055_v25  ;;  %v1128_v29 = vcombine.low %v3932_v40, %v1051_v24  ;;  %v1129_v39 = vcombine.high %v3932_v40, %v1051_v24 }
 0x335   :  { %v3964_v28 = vpop.eup %3352 }
 0x336   :  { %v1084_v36 = vrot.slane %v1076_v26, %v3767_v38  ;;  %v1091_v37 = vrot.slane %v1077_v27, %v3767_v38  ;;  %v2004_v32 = vsel %vm1332_vm2, %v3964_v28, 0.0  ;;  %v1136_v59 = vrot.slane %v1128_v29, %v3767_v38 }
 0x337   :  { %v1057_v31 = vpop.permute.xlu1 %1056  ;;  %2005 = vadd.xlane.f32.xlu0 %v2004_v32  ;;  %v1143_v44 = vrot.slane %v1129_v39, %v3767_v38 }
 0x338   :  { %v1092_v33 = vcombine.low %v1068_v30, %v1084_v36  ;;  %v1093_v11 = vcombine.high %v1068_v30, %v1084_v36  ;;  %v1108_v12 = vcombine.low %v1075_v35, %v1091_v37  ;;  %v1109_v57 = vcombine.high %v1075_v35, %v1091_v37 }
 0x339   :  { %v3974_v58 = vpop.eup %3354  ;;  %v1144_v60 = vcombine.low %v1045_v18, %v1057_v31  ;;  %v1145_v34 = vcombine.high %v1045_v18, %v1057_v31 }
 0x33a   :  { %v1100_v41 = vrot.slane %v1092_v33, %v3775_v50  ;;  %v1107_v42 = vrot.slane %v1093_v11, %v3775_v50  ;;  %v1116_v40 = vrot.slane %v1108_v12, %v3775_v50  ;;  %v1123_v43 = vrot.slane %v1109_v57, %v3775_v50 }
 0x33b   :  { %v1152_v45 = vrot.slane %v1144_v60, %v3767_v38  ;;  %v1159_v46 = vrot.slane %v1145_v34, %v3767_v38  ;;  %v2007_v47 = vsel %vm1332_vm2, %v3974_v58, 0.0 }
 0x33c   :  { %v1196_v48 = vcombine.low %v1100_v41, %v1116_v40  ;;  %v1204_v49 = vcombine.low %v1107_v42, %v1123_v43  ;;  %v3107_v51 = vcombine.high %v1100_v41, %v1116_v40  ;;  %v3108_v52 = vcombine.high %v1107_v42, %v1123_v43  ;;  %2008 = vadd.xlane.f32.xlu0 %v2007_v47 }
 0x33d   :  { %v3986_v53 = vpop.eup %3356  ;;  %v1160_v54 = vcombine.low %v1136_v59, %v1152_v45  ;;  %v1161_v21 = vcombine.high %v1136_v59, %v1152_v45  ;;  %v1176_v56 = vcombine.low %v1143_v44, %v1159_v46  ;;  %v1177_v61 = vcombine.high %v1143_v44, %v1159_v46 }
 0x33e   :  { %v1203_v62 = vrot.slane %v1196_v48, %v3767_v38  ;;  %v1211_v63 = vrot.slane %v1204_v49, %v3767_v38  ;;  %v1271_v1 = vrot.slane %v3107_v51, %v3767_v38  ;;  %v1279_v2 = vrot.slane %v3108_v52, %v3767_v38 }
 0x33f   :  { %v1168_v3 = vrot.slane %v1160_v54, %v3775_v50  ;;  %v1175_v4 = vrot.slane %v1161_v21, %v3775_v50  ;;  %v1184_v6 = vrot.slane %v1176_v56, %v3775_v50  ;;  %v1191_v7 = vrot.slane %v1177_v61, %v3775_v50 }
 0x340   :  { %v2010_v8 = vsel %vm1332_vm2, %v3986_v53, 0.0  ;;  %v1229_v9 = vcombine.high %v1203_v62, %v1211_v63  ;;  %v1296_v10 = vcombine.low %v1271_v1, %v1279_v2  ;;  %v1228_v19 = vcombine.low %v1203_v62, %v1211_v63 }
 0x341   :  { %v1212_v14 = vcombine.low %v1168_v3, %v1184_v6  ;;  %v1220_v15 = vcombine.low %v1175_v4, %v1191_v7  ;;  %v3109_v16 = vcombine.high %v1168_v3, %v1184_v6  ;;  %v3110_v18 = vcombine.high %v1175_v4, %v1191_v7  ;;  %2011 = vadd.xlane.f32.xlu1 %v2010_v8 }
 0x342   :  { %v1297_v20 = vcombine.high %v1271_v1, %v1279_v2  ;;  %v1236_v36 = vrot.slane %v1228_v19, %v3775_v50  ;;  %v1243_v37 = vrot.slane %v1229_v9, %v3775_v50  ;;  %v1304_v11 = vrot.slane %v1296_v10, %v3775_v50 }
 0x343   :  { %v1219_v23 = vrot.slane %v1212_v14, %v3767_v38  ;;  %v1227_v24 = vrot.slane %v1220_v15, %v3767_v38  ;;  %v1287_v25 = vrot.slane %v3109_v16, %v3767_v38  ;;  %v1295_v26 = vrot.slane %v3110_v18, %v3767_v38 }
 0x344   :  { %v4012_v12 = vrot.slane %v1297_v20, %v3775_v50 }
 0x345   :  { %v1244_v27 = vcombine.low %v1219_v23, %v1227_v24  ;;  %v1245_v29 = vcombine.high %v1219_v23, %v1227_v24  ;;  %v1312_v30 = vcombine.low %v1287_v25, %v1295_v26  ;;  %v1313_v35 = vcombine.high %v1287_v25, %v1295_v26 }
 0x347   :  { %v1252_v39 = vrot.slane %v1244_v27, %v3775_v50  ;;  %v1259_v31 = vrot.slane %v1245_v29, %v3775_v50  ;;  %v1320_v32 = vrot.slane %v1312_v30, %v3775_v50  ;;  %v4008_v33 = vrot.slane %v1313_v35, %v3775_v50  ;;  %v2919_v29 = vld [vmem:[#allocation13 + $0x10] sm:$0xff] }
 0x349   :  { %v1260_v57 = vcombine.low %v1236_v36, %v1252_v39  ;;  %v1261_v59 = vcombine.high %v1236_v36, %v1252_v39  ;;  %v1262_v60 = vcombine.low %v1243_v37, %v1259_v31  ;;  %v1263_v34 = vcombine.high %v1243_v37, %v1259_v31 }
 0x34a   :  { %v1328_v41 = vcombine.low %v1304_v11, %v1320_v32  ;;  %v1329_v42 = vcombine.high %v1304_v11, %v1320_v32  ;;  %v1330_v40 = vcombine.low %v4012_v12, %v4008_v33  ;;  %v1331_v43 = vcombine.high %v4012_v12, %v4008_v33 }
 0x34b   :  { %3272 = vmatpush3.msra.mxu0 %v1260_v57  ;;  %3277 = vmatpush3.msra.mxu1 %v1261_v59 }
 0x34c   :  { %3281 = vmatprep.subr.mxu0 %v3578_v22  ;;  %3286 = vmatprep.subr.mxu1 %v3578_v22 }
 0x3ac   :  { %v1991_v44 = vpop.xlane.xlu1 %1990 }
 0x3ad   :  { %3358 = vrcp.f32 %v1991_v44 }
 0x3b0   :  { %v1994_v45 = vpop.xlane.xlu0 %1993 }
 0x3b1   :  { %3360 = vrcp.f32 %v1994_v45 }
 0x3b4   :  { %v1997_v46 = vpop.xlane.xlu1 %1996 }
 0x3b5   :  { %3362 = vrcp.f32 %v1997_v46 }
 0x3b8   :  { %v2000_v47 = vpop.xlane.xlu0 %1999 }
 0x3b9   :  { %3364 = vrcp.f32 %v2000_v47 }
 0x3ba   :  { %v3359_v48 = vpop.eup %3358 }
 0x3bb   :  { %v2014_v49 = vmul.f32 %v3359_v48, %v3942_v55 }
 0x3bc   :  { %v2003_v51 = vpop.xlane.xlu1 %2002 }
 0x3bd   :  { %3366 = vrcp.f32 %v2003_v51  ;;  %3274 = vmatmul.mubr.msk.f32.vlgmr.msra.gmra.mxu0 %vm1332_vm2, %v2014_v49 }
 0x3be   :  { %v3361_v52 = vpop.eup %3360  ;;  %3282 = vmatpush3.msra.mxu0 %v1262_v60  ;;  %3283 = vmatprep.mubr.msk.f32.mxu0 %vm3579_vm1, %v3578_v22 }
 0x3bf   :  { %v2016_v54 = vmul.f32 %v3361_v52, %v3946_v0  ;;  %3291 = vmatprep.subr.mxu0 %v3578_v22  ;;  %v3023_v0 = vsel %vm1332_vm2, %v2014_v49, 0.0 }
 0x3c0   :  { %v2006_v21 = vpop.xlane.xlu0 %2005 }
 0x3c1   :  { %3279 = vmatmul.mubr.msk.f32.vlgmr.msra.gmra.mxu1 %vm1332_vm2, %v2016_v54  ;;  %3368 = vrcp.f32 %v2006_v21  ;;  %v3024_v61 = vsel %vm1332_vm2, %v2016_v54, 0.0 }
 0x3c2   :  { %v3363_v56 = vpop.eup %3362  ;;  %3287 = vmatpush3.msra.mxu1 %v1263_v34  ;;  %3288 = vmatprep.mubr.msk.f32.mxu1 %vm3579_vm1, %v3578_v22  ;;  %v3025_v2 = vadd.f32 %v3024_v61, %v3023_v0 }
 0x3c3   :  { %v2018_v55 = vmul.f32 %v3363_v56, %v3950_v5  ;;  %3296 = vmatprep.subr.mxu1 %v3578_v22 }
 0x3c5   :  { %v2009_v62 = vpop.xlane.xlu0 %2008  ;;  %3284 = vmatmul.mubr.msk.f32.vlgmr.msra.gmra.mxu0 %vm1332_vm2, %v2018_v55  ;;  %v3026_v63 = vsel %vm1332_vm2, %v2018_v55, 0.0 }
 0x3c6   :  { %v3365_v1 = vpop.eup %3364  ;;  %3370 = vrcp.f32 %v2009_v62  ;;  %3292 = vmatpush3.msra.mxu0 %v1328_v41  ;;  %3293 = vmatprep.mubr.msk.f32.mxu0 %vm3579_vm1, %v3578_v22  ;;  %v3027_v3 = vadd.f32 %v3026_v63, %v3025_v2 }
 0x3c7   :  { %v2020_v5 = vmul.f32 %v3365_v1, %v3954_v13  ;;  %3301 = vmatprep.subr.mxu0 %v3578_v22 }
 0x3c9   :  { %3289 = vmatmul.mubr.msk.f32.vlgmr.msra.gmra.mxu1 %vm1332_vm2, %v2020_v5  ;;  %v3028_v4 = vsel %vm1332_vm2, %v2020_v5, 0.0 }
 0x3ca   :  { %v3367_v6 = vpop.eup %3366  ;;  %v2012_v7 = vpop.xlane.xlu1 %2011  ;;  %3297 = vmatpush3.msra.mxu1 %v1329_v42  ;;  %3298 = vmatprep.mubr.msk.f32.mxu1 %vm3579_vm1, %v3578_v22  ;;  %v3029_v8 = vadd.f32 %v3028_v4, %v3027_v3 }
 0x3cb   :  { %3372 = vrcp.f32 %v2012_v7  ;;  %v2022_v9 = vmul.f32 %v3367_v6, %v3958_v17  ;;  %3306 = vmatprep.subr.mxu1 %v3578_v22 }
 0x3cc   :  { %v3038_v13 = vmul.f32 0.25, %v3029_v8 }
 0x3cd   :  { %3294 = vmatmul.mubr.msk.f32.vlgmr.msra.gmra.mxu0 %vm1332_vm2, %v2022_v9  ;;  %v3030_v18 = vsel %vm1332_vm2, %v2022_v9, 0.0 }
 0x3ce   :  { %3302 = vmatpush3.msra.mxu0 %v1330_v40  ;;  %3303 = vmatprep.mubr.msk.f32.mxu0 %vm3579_vm1, %v3578_v22  ;;  %3040 = vst.msk [vmem:[#allocation15] sm:$0xff] %vm1332_vm2, %v3038_v13  ;;  %v3369_v10 = vpop.eup %3368 }
 0x3cf   :  { %v2024_v14 = vmul.f32 %v3369_v10, %v3964_v28 }
 0x3d1   :  { %3299 = vmatmul.mubr.msk.f32.vlgmr.msra.gmra.mxu1 %vm1332_vm2, %v2024_v14  ;;  %v3031_v16 = vsel %vm1332_vm2, %v2024_v14, 0.0 }
 0x3d2   :  { %3307 = vmatpush3.msra.mxu1 %v1331_v43  ;;  %3308 = vmatprep.mubr.msk.f32.mxu1 %vm3579_vm1, %v3578_v22  ;;  %v3032_v23 = vadd.f32 %v3031_v16, %v3030_v18 }
 0x3d3   :  { %v3371_v15 = vpop.eup %3370 }
 0x3d4   :  { %v2026_v17 = vmul.f32 %v3371_v15, %v3974_v58  ;;  %v2920_v58 = vld [vmem:[#allocation13 + $0x18] sm:$0xff] }
 0x3d5   :  { %3311 = vmatprep.subr.msk.mxu0 %vm150_vm0, %v2920_v58 }
 0x3d6   :  { %3304 = vmatmul.mubr.msk.f32.vlgmr.msra.gmra.mxu0 %vm1332_vm2, %v2026_v17  ;;  %v3033_v19 = vsel %vm1332_vm2, %v2026_v17, 0.0 }
 0x3d7   :  { %v3034_v24 = vadd.f32 %v3033_v19, %v3032_v23  ;;  %3312 = vmatpush3.xpose.msk.msra.mxu0 %vm150_vm0, %v2920_v58 }
 0x3d8   :  { %v3373_v20 = vpop.eup %3372  ;;  %3313 = vmatprep.subr.msk.mxu0 %vm150_vm0, %v2919_v29 }
 0x3d9   :  { %v2028_v28 = vmul.f32 %v3373_v20, %v3986_v53 }
 0x3db   :  { %3309 = vmatmul.mubr.msk.f32.vlgmr.msra.gmra.mxu1 %vm1332_vm2, %v2028_v28  ;;  %v3035_v25 = vsel %vm1332_vm2, %v2028_v28, 0.0  ;;  %3314 = vmatpush3.xpose.msk.msra.mxu0 %vm150_vm0, %v2919_v29 }
 0x3dc   :  { %v3036_v26 = vadd.f32 %v3035_v25, %v3034_v24  ;;  %v2918_v25 = vld [vmem:[#allocation13 + $0x8] sm:$0xff] }
 0x3dd   :  { %3315 = vmatprep.subr.msk.mxu0 %vm150_vm0, %v2918_v25 }
 0x3de   :  { %v3039_v27 = vmul.f32 0.25, %v3036_v26 }
 0x3df   :  { %3316 = vmatpush3.xpose.msk.msra.mxu0 %vm150_vm0, %v2918_v25 }
 0x3e0   :  { %3041 = vst.msk [vmem:[#allocation15 + $0x8] sm:$0xff] %vm1332_vm2, %v3039_v27 }
 0x47d   :  { %v2098_v53 = vpop.f32.mrf.mxu0 }
 0x47f   :  { %v3275_v30 = vpop.f32.mrf.mxu0 }
 0x481   :  { %v2171_v35 = vpop.f32.mrf.mxu1 }
 0x483   :  { %v3280_v36 = vpop.f32.mrf.mxu1 }
 0x485   :  { %v2244_v37 = vpop.f32.mrf.mxu0 }
 0x486   :  { %v2613_v59 = vcombine.low %v2098_v53, %v2244_v37  ;;  %v2614_v60 = vcombine.high %v2098_v53, %v2244_v37 }
 0x487   :  { %v3285_v39 = vpop.f32.mrf.mxu0 }
 0x488   :  { %v2621_v43 = vrot.slane %v2613_v59, %v3767_v38  ;;  %v2628_v44 = vrot.slane %v2614_v60, %v3767_v38 }
 0x489   :  { %v2317_v31 = vpop.f32.mrf.mxu1 }
 0x48a   :  { %v2629_v11 = vcombine.low %v2171_v35, %v2317_v31  ;;  %v2630_v12 = vcombine.high %v2171_v35, %v2317_v31 }
 0x48b   :  { %v3290_v32 = vpop.f32.mrf.mxu1 }
 0x48c   :  { %v2637_v41 = vrot.slane %v2629_v11, %v3767_v38  ;;  %v2644_v42 = vrot.slane %v2630_v12, %v3767_v38 }
 0x48d   :  { %v2390_v33 = vpop.f32.mrf.mxu0 }
 0x48e   :  { %v2645_v46 = vcombine.low %v2621_v43, %v2637_v41  ;;  %v2646_v47 = vcombine.high %v2621_v43, %v2637_v41  ;;  %v2661_v48 = vcombine.low %v2628_v44, %v2644_v42  ;;  %v2662_v49 = vcombine.high %v2628_v44, %v2644_v42 }
 0x48f   :  { %v3295_v57 = vpop.f32.mrf.mxu0 }
 0x490   :  { %v2653_v21 = vrot.slane %v2645_v46, %v3775_v50  ;;  %v2660_v56 = vrot.slane %v2646_v47, %v3775_v50  ;;  %v2669_v55 = vrot.slane %v2661_v48, %v3775_v50  ;;  %v2676_v61 = vrot.slane %v2662_v49, %v3775_v50 }
 0x491   :  { %v2463_v34 = vpop.f32.mrf.mxu1 }
 0x492   :  { %v2677_v6 = vcombine.high %v2653_v21, %v3578_v22  ;;  %v2678_v7 = vcombine.high %v2660_v56, %v3578_v22  ;;  %v2679_v8 = vcombine.high %v2669_v55, %v3578_v22  ;;  %v2680_v9 = vcombine.high %v2676_v61, %v3578_v22 }
 0x493   :  { %v3300_v40 = vpop.f32.mrf.mxu1 }
 0x494   :  { %v2817_v20 = vcombine.low %v2669_v55, %v2679_v8  ;;  %v2833_v23 = vcombine.low %v2676_v61, %v2680_v9  ;;  %v2749_v28 = vcombine.low %v2653_v21, %v2677_v6  ;;  %v2765_v24 = vcombine.low %v2660_v56, %v2678_v7 }
 0x496   :  { %v2536_v45 = vpop.f32.mrf.mxu0  ;;  %v2824_v37 = vrot.slane %v2817_v20, %v3767_v38  ;;  %v2840_v39 = vrot.slane %v2833_v23, %v3767_v38  ;;  %v2756_v31 = vrot.slane %v2749_v28, %v3767_v38  ;;  %v2772_v32 = vrot.slane %v2765_v24, %v3767_v38 }
 0x497   :  { %v2681_v52 = vcombine.low %v2390_v33, %v2536_v45  ;;  %v2682_v54 = vcombine.high %v2390_v33, %v2536_v45  ;;  %v2917_v33 = vld [vmem:[#allocation13] sm:$0xff] }
 0x498   :  { %v3305_v51 = vpop.f32.mrf.mxu0  ;;  %3317 = vmatprep.subr.msk.mxu0 %vm150_vm0, %v2917_v33 }
 0x499   :  { %v2689_v2 = vrot.slane %v2681_v52, %v3767_v38  ;;  %v2696_v5 = vrot.slane %v2682_v54, %v3767_v38  ;;  %3318 = vmatpush3.xpose.msk.msra.mxu0 %vm150_vm0, %v2917_v33 }
 0x49b   :  { %v2609_v62 = vpop.f32.mrf.mxu1 }
 0x49c   :  { %v2697_v0 = vcombine.low %v2463_v34, %v2609_v62  ;;  %v2698_v63 = vcombine.high %v2463_v34, %v2609_v62 }
 0x49d   :  { %v3310_v1 = vpop.f32.mrf.mxu1 }
 0x49e   :  { %v2705_v3 = vrot.slane %v2697_v0, %v3767_v38  ;;  %v2712_v4 = vrot.slane %v2698_v63, %v3767_v38 }
 0x4a0   :  { %v2713_v13 = vcombine.low %v2689_v2, %v2705_v3  ;;  %v2714_v10 = vcombine.high %v2689_v2, %v2705_v3  ;;  %v2729_v14 = vcombine.low %v2696_v5, %v2712_v4  ;;  %v2730_v15 = vcombine.high %v2696_v5, %v2712_v4 }
 0x4a2   :  { %v2721_v17 = vrot.slane %v2713_v13, %v3775_v50  ;;  %v2728_v16 = vrot.slane %v2714_v10, %v3775_v50  ;;  %v2737_v18 = vrot.slane %v2729_v14, %v3775_v50  ;;  %v2744_v19 = vrot.slane %v2730_v15, %v3775_v50 }
 0x4a4   :  { %v2745_v26 = vcombine.high %v2721_v17, %v3578_v22  ;;  %v2746_v27 = vcombine.high %v2728_v16, %v3578_v22  ;;  %v2747_v58 = vcombine.high %v2737_v18, %v3578_v22  ;;  %v2748_v29 = vcombine.high %v2744_v19, %v3578_v22 }
 0x4a6   :  { %v2825_v53 = vcombine.low %v2737_v18, %v2747_v58  ;;  %v2841_v30 = vcombine.low %v2744_v19, %v2748_v29  ;;  %v2757_v35 = vcombine.low %v2721_v17, %v2745_v26  ;;  %v2773_v36 = vcombine.low %v2728_v16, %v2746_v27 }
 0x4a8   :  { %v2832_v11 = vrot.slane %v2825_v53, %v3767_v38  ;;  %v2848_v22 = vrot.slane %v2841_v30, %v3767_v38  ;;  %v2764_v12 = vrot.slane %v2757_v35, %v3767_v38  ;;  %v2780_v57 = vrot.slane %v2773_v36, %v3767_v38 }
 0x4aa   :  { %v2849_v59 = vcombine.low %v2824_v37, %v2832_v11  ;;  %v2865_v60 = vcombine.low %v2840_v39, %v2848_v22  ;;  %v2781_v34 = vcombine.low %v2756_v31, %v2764_v12  ;;  %v2797_v41 = vcombine.low %v2772_v32, %v2780_v57 }
 0x4ab   :  { %v2850_v42 = vcombine.high %v2824_v37, %v2832_v11  ;;  %v2866_v40 = vcombine.high %v2840_v39, %v2848_v22  ;;  %v2782_v43 = vcombine.high %v2756_v31, %v2764_v12  ;;  %v2798_v44 = vcombine.high %v2772_v32, %v2780_v57 }
 0x4ac   :  { %v2857_v45 = vrot.slane %v2849_v59, %v3775_v50  ;;  %v2873_v46 = vrot.slane %v2865_v60, %v3775_v50  ;;  %v2789_v47 = vrot.slane %v2781_v34, %v3775_v50  ;;  %v2805_v38 = vrot.slane %v2797_v41, %v3775_v50 }
 0x4ad   :  { %v2864_v48 = vrot.slane %v2850_v42, %v3775_v50  ;;  %v2880_v49 = vrot.slane %v2866_v40, %v3775_v50  ;;  %v2796_v51 = vrot.slane %v2782_v43, %v3775_v50  ;;  %v2812_v52 = vrot.slane %v2798_v44, %v3775_v50 }
 0x4ae   :  { %v2882_v54 = vcombine.high %v2857_v45, %v2873_v46  ;;  %v2881_v21 = vcombine.low %v2857_v45, %v2873_v46  ;;  %v2814_v56 = vcombine.high %v2789_v47, %v2805_v38  ;;  %v2813_v55 = vcombine.low %v2789_v47, %v2805_v38 }
 0x4af   :  { %v2883_v61 = vcombine.low %v2864_v48, %v2880_v49  ;;  %v2815_v62 = vcombine.low %v2796_v51, %v2812_v52  ;;  %v2884_v0 = vcombine.high %v2864_v48, %v2880_v49  ;;  %v2816_v63 = vcombine.high %v2796_v51, %v2812_v52 }
 0x4b0   :  { %2889 = vrot.lane.b32.xlu1 %v2882_v54, %s3569_s27  ;;  %2887 = vrot.lane.b32.xlu0 %v2814_v56, %s3569_s27 }
 0x4b4   :  { %2897 = vrot.lane.b32.xlu1 %v2883_v61, %s3582_s9  ;;  %2895 = vrot.lane.b32.xlu0 %v2815_v62, %s3582_s9 }
 0x4b8   :  { %2905 = vrot.lane.b32.xlu1 %v2884_v0, %s3583_s22  ;;  %2903 = vrot.lane.b32.xlu0 %v2816_v63, %s3583_s22 }
 0x522   :  { %v2890_v1 = vpop.permute.xlu1 %2889  ;;  %v2888_v50 = vpop.permute.xlu0 %2887 }
 0x523   :  { %v2910_v3 = vsel %vm1332_vm2, %v2881_v21, %v2890_v1  ;;  %v2909_v4 = vsel %vm1332_vm2, %v2813_v55, %v2888_v50 }
 0x526   :  { %v2898_v2 = vpop.permute.xlu1 %2897  ;;  %v2896_v5 = vpop.permute.xlu0 %2895 }
 0x527   :  { %v2913_v6 = vsel %vm2911_vm3, %v2910_v3, %v2898_v2  ;;  %v2912_v7 = vsel %vm2911_vm3, %v2909_v4, %v2896_v5 }
 0x52a   :  { %v2906_v8 = vpop.permute.xlu1 %2905  ;;  %v2904_v9 = vpop.permute.xlu0 %2903 }
 0x52b   :  { %v2916_v13 = vsel %vm2914_vm4, %v2913_v6, %v2906_v8  ;;  %v2915_v10 = vsel %vm2914_vm4, %v2912_v7, %v2904_v9 }
 0x52c   :  { %3319 = vmatprep.mubr.msk.f32.mxu0 %vm150_vm0, %v2915_v10 }
 0x52d   :  { %3320 = vmatmul.mubr.msk.f32.vlgmr.msra.gmra.mxu0 %vm150_vm0, %v2916_v13 }
 0x52e   :  { %3525 = shalt.err (!%p3522_p11)
}
 0x52f   :  { %3065 = dma.vmem_to_hbm [thread:$0]  %s3060_s24, 256, %s4145_s12, [#allocation16], %s3568_s26, %s3568_s26, %s3569_s27  }
 0x530   :  { %v3135_v14 = vld [vmem:[%s4143_s10] ss:$0 sm:$0xff]  ;;  %s3585_s0 = smov [#allocation14]  }
 0x531   :  { %s3047_s13 = sshll.u32 %s3585_s0, 4  ;;  %s3048_s13 = int_to_ptr.vmem [resolvable:$true] %s3047_s13 }
 0x532   :  { %s3534_s14 = scalar_lea.vmem %s3048_s13, 256  ;;  %p3539_p13 = scmp.lt.s32.totalorder %s3048_s13, %s3048_s13 }
 0x533   :  { %p3535_p12 = scmp.ne.s32.totalorder %s3048_s13, %s3534_s14  ;;  %p3540_p0 = scmp.lt.s32.totalorder %s3534_s14, %s3534_s14 }
 0x535   :  { %p3541_p1 = por %p3540_p0, %p3539_p13 }
 0x537   :  { %p3542_p2 = pnand %p3541_p1, %p3535_p12 }
 0x5ed   :  { %v3321_v15 = vpop.f32.mrf.mxu0 }
 0x5ee   :  { %v3018_v17 = vadd.f32 %v3321_v15, %v3135_v14 }
 0x5ef   :  { %v3012_v16 = vpop.f32.mrf.mxu0 }
 0x5f0   :  { %3022 = vst.msk [vmem:[#allocation14 + $0x8] sm:$0xff] %vm150_vm0, %v3018_v17  ;;  %v3013_v18 = vadd.f32 %v3135_v14, %v3012_v16 }
 0x5f2   :  { %3021 = vst.msk [vmem:[#allocation14] sm:$0xff] %vm150_vm0, %v3013_v18 }
 0x5f3   :  { %3545 = shalt.err (!%p3542_p2)
}
 0x5f4   :  { %3053 = dma.vmem_to_hbm [thread:$0]  %s3048_s13, 256, %s4144_s11, [#allocation4], %s3568_s26, %s3568_s26, %s3569_s27  }
 0x5f5   :  { %3562 = dma.done.wait [#allocation4], 256  }
 0x5f6   :  { %3563 = vsyncadd [#allocation4], 4294967040 }
 0x5f7   :  { %3564 = dma.done.wait [#allocation16], 256  }
 0x5f8   :  { %3565 = vsyncadd [#allocation16], 4294967040 }
 0x5f9   :  { %3072 = vsyncpa [#allocation3], 1 }
 0x5fa   :  { %3073 = vsyncpa [#allocation6], 1 }
 0x5fb   :  { %3074 = vsyncpa [#allocation9], 1 }
 0x5fc   :  { %3075 = vsyncpa [#allocation12], 1 }
 0x5fd   :  { %3076 = vsyncpa [#allocation4], 1 }
 0x5fe   :  { %3077 = vsyncpa [#allocation16], 1 }

</bundles_post_ra>
